<compile_context>
chip_gen: v7x
topology: tpu7x:2x2x1
jax: 0.10.0
libtpu: 0.0.40
codegen_flags: <defaults>
</compile_context>

<pallas_src>
import jax
import jax.numpy as jnp
from jax.experimental import pallas as pl
from jax.experimental.pallas import tpu as pltpu

_LANE = 128
_SUB = 8
_MAX_BLOCK_ROWS = 1024   # 1024 x 128 x 4B = 512 KiB/buffer (x2 double-buffered ≈ 1 MiB)


def _make_sum_kernel(block_rows: int, rows_total: int, grid: int):
    """Build a kernel producing an (8,128) slab of partial sums of relu(0.9 - r)."""
    last_valid = rows_total - (grid - 1) * block_rows  # valid rows in the last block

    def kernel(r_ref, o_ref):
        i = pl.program_id(0)

        @pl.when(i == 0)
        def _():
            o_ref[...] = jnp.zeros_like(o_ref)

        x = r_ref[...].astype(jnp.float32)                      # per-tile upcast (VPU)
        t = jnp.maximum(jnp.float32(0.9) - x, jnp.float32(0.0))

        if last_valid != block_rows:                            # only emitted when needed
            row = jax.lax.broadcasted_iota(jnp.int32, t.shape, 0)
            limit = jnp.where(i == grid - 1, last_valid, block_rows)
            t = jnp.where(row < limit, t, jnp.float32(0.0))

        # Fold the block onto the (8,128) resident accumulator: VPU adds only.
        o_ref[...] += t.reshape(-1, _SUB, _LANE).sum(axis=0)

    return kernel


@jax.jit
def loss_dsc_real(r):
    """JAX/Pallas equivalent of LossDSCreal().forward(r) -> scalar f32."""
    n = r.size
    if n == 0:
        return jnp.float32(jnp.nan)   # torch .mean() of an empty tensor is NaN

    flat = r.reshape(-1)              # native dtype; no wrapper-side cast/pad
    rows = n // _LANE

    total = jnp.float32(0.0)
    covered = 0

    if rows >= _SUB:
        block_rows = min(_MAX_BLOCK_ROWS, (rows // _SUB) * _SUB)
        grid = pl.cdiv(rows, block_rows)
        covered = rows * _LANE
        x2d = flat[:covered].reshape(rows, _LANE)   # no-op slice when n % 128 == 0

        partial = pl.pallas_call(
            _make_sum_kernel(block_rows, rows, grid),
            out_shape=jax.ShapeDtypeStruct((_SUB, _LANE), jnp.float32),
            grid_spec=pltpu.PrefetchScalarGridSpec(
                num_scalar_prefetch=0,
                grid=(grid,),
                in_specs=[pl.BlockSpec((block_rows, _LANE), lambda i: (i, 0))],
                out_specs=pl.BlockSpec((_SUB, _LANE), lambda i: (0, 0)),
            ),
            compiler_params=pltpu.CompilerParams(
                dimension_semantics=("arbitrary",),   # sequential reduction axis
            ),
        )(x2d)
        total = jnp.sum(partial)

    # Remainder not covered by the kernel: the < 128-element lane tail, or a
    # tiny input with fewer than 8 full rows.  Plain jnp, negligible bytes.
    tail = flat[covered:]
    if tail.size:
        total = total + jnp.sum(
            jnp.maximum(jnp.float32(0.9) - tail.astype(jnp.float32), jnp.float32(0.0)))

    return total / jnp.float32(n)


if __name__ == "__main__":
    key = jax.random.PRNGKey(0)
    # Discriminator realism scores, e.g. patch-GAN output: (N, C, H, W) = (2, 4, 16, 16)
    r = jax.random.normal(key, (2, 4, 16, 16), dtype=jnp.float32)

    loss = loss_dsc_real(r)
    jax.block_until_ready(loss)

    # Pure-JAX reference check of the semantics: mean(relu(0.9 - r))
    ref = jnp.mean(jnp.maximum(0.9 - r, 0.0))
    assert jnp.allclose(loss, ref, atol=1e-5, rtol=1e-5), (loss, ref)

    print("KERNEL_OK")
</pallas_src>

<mosaic_0001>
module attributes {stable_mosaic.version = 11 : i64} {
  func.func @kernel(%arg0: i32, %arg1: memref<16x128xf32, #tpu.memory_space<vmem>>, %arg2: memref<8x128xf32, #tpu.memory_space<vmem>>) attributes {dimension_semantics = [#tpu.dimension_semantics<arbitrary>], iteration_bounds = array<i64: 1>, scalar_prefetch = 0 : i64, scratch_operands = 0 : i64, tpu.core_type = #tpu.core_type<tc>, window_params = [{transform_indices = @transform_0, window_bounds = array<i64: 16, 128>}, {pipeline_mode = #tpu.pipeline_mode<synchronous>, transform_indices = @transform_1, window_bounds = array<i64: 8, 128>}]} {
    %c0_i32 = arith.constant 0 : i32
    %0 = arith.cmpi eq, %arg0, %c0_i32 : i32
    %1 = arith.extui %0 : i1 to i32
    %c0_i32_0 = arith.constant 0 : i32
    %2 = arith.cmpi ne, %1, %c0_i32_0 : i32
    scf.if %2 {
      %cst_8 = arith.constant 0.000000e+00 : f32
      %13 = vector.broadcast %cst_8 : f32 to vector<8x128xf32>
      %c0_9 = arith.constant 0 : index
      %c0_10 = arith.constant 0 : index
      %14 = vector.load %arg2[%c0_9, %c0_10] : memref<8x128xf32, #tpu.memory_space<vmem>>, vector<8x128xf32>
      tpu.vector_store %arg2[%c0_9, %c0_10], %13 {strides = array<i32>} : memref<8x128xf32, #tpu.memory_space<vmem>>, vector<8x128xf32>,
    } else {
    }
    %c0 = arith.constant 0 : index
    %c0_1 = arith.constant 0 : index
    %3 = vector.load %arg1[%c0, %c0_1] : memref<16x128xf32, #tpu.memory_space<vmem>>, vector<16x128xf32>
    %cst = arith.constant 0.899999976 : f32
    %4 = vector.broadcast %cst : f32 to vector<16x128xf32>
    %5 = arith.subf %4, %3 : vector<16x128xf32>
    %cst_2 = arith.constant 0.000000e+00 : f32
    %6 = vector.broadcast %cst_2 : f32 to vector<16x128xf32>
    %7 = arith.maximumf %5, %6 : vector<16x128xf32>
    %c0_3 = arith.constant 0 : index
    %c0_4 = arith.constant 0 : index
    %8 = vector.load %arg2[%c0_3, %c0_4] : memref<8x128xf32, #tpu.memory_space<vmem>>, vector<8x128xf32>
    %9 = vector.shape_cast %7 : vector<16x128xf32> to vector<2x8x128xf32>
    %cst_5 = arith.constant dense<0.000000e+00> : vector<8x128xf32>
    %10 = vector.multi_reduction <add>, %9, %cst_5 [0] : vector<2x8x128xf32> to vector<8x128xf32>
    %11 = arith.addf %8, %10 : vector<8x128xf32>
    %c0_6 = arith.constant 0 : index
    %c0_7 = arith.constant 0 : index
    %12 = vector.load %arg2[%c0_6, %c0_7] : memref<8x128xf32, #tpu.memory_space<vmem>>, vector<8x128xf32>
    tpu.vector_store %arg2[%c0_6, %c0_7], %11 {strides = array<i32>} : memref<8x128xf32, #tpu.memory_space<vmem>>, vector<8x128xf32>,
    return
  }
  func.func @transform_0(%arg0: i32) -> (i32, i32) {
    %c0_i32 = arith.constant 0 : i32
    %c0_i32_0 = arith.constant 0 : i32
    return %arg0, %c0_i32 : i32, i32
  }
  func.func @transform_1(%arg0: i32) -> (i32, i32) {
    %c0_i32 = arith.constant 0 : i32
    %c0_i32_0 = arith.constant 0 : i32
    %c0_i32_1 = arith.constant 0 : i32
    return %c0_i32, %c0_i32_0 : i32, i32
  }
}

</mosaic_0001>

<bundles_post_ra>
// kernel: loss_dsc_real.1
= control target key start
LH: loop header
LB: loop body
LE: loop exit
PB: predicated region body
PF: predicated region fallthrough
CT: control target
= control target key end

     0   :  { %s47_s0 = inlined_call_operand.vmem [shape: f32[16,128], index: 0, kind: input, shape index: {}]   ;;  %s48_s1 = inlined_call_operand.vmem [shape: f32[8,128], index: 1, kind: output, shape index: {}]  }
   0x1   :  { %v13_v0 = vld [vmem:[%s47_s0] sm:$0xff]  ;;  %v14_v1 = vld [vmem:[%s47_s0 + $0x8] sm:$0xff] }
   0x2   :  { %v15_v2 = vsub.f32 0.9, %v13_v0  ;;  %v16_v3 = vsub.f32 0.9, %v14_v1 }
   0x4   :  { %v17_v4 = vmax.f32 %v15_v2, 0.0  ;;  %v18_v5 = vmax.f32 %v16_v3, 0.0 }
   0x6   :  { %v20_v6 = vadd.f32 %v18_v5, %v17_v4 }
   0x8   :  { %22 = vst [vmem:[%s48_s1] sm:$0xff] %v20_v6 }

</bundles_post_ra>
